<compile_context>
chip_gen: v6e
topology: v6e:2x2x1
jax: 0.10.0
libtpu: 0.0.40
codegen_flags: <defaults>
</compile_context>

<pallas_src>
import math

import jax
import jax.numpy as jnp
from jax.experimental import pallas as pl
from jax.experimental.pallas import tpu as pltpu


# ---------------------------------------------------------------------------
# Kernel A (used twice): [affine (folded BN of previous stage) + PReLU] ->
#                        3x3 conv as 3 banded MXU matmuls ->
#                        per-image BN partial sums (sum, sum of squares).
# Stage 1 passes scale=1, shift=0, alpha=1 so the activation is the identity.
# ---------------------------------------------------------------------------
def _act_conv_kernel(x_ref, scale_ref, shift_ref, alpha_ref, b_ref,
                     y_ref, psum_ref):
    H = x_ref.shape[1]
    WC = x_ref.shape[2]

    # Affine + PReLU in f32 on the VPU.
    a = x_ref[0].astype(jnp.float32) * scale_ref[...] + shift_ref[...]
    alpha = alpha_ref[0]                       # scalar from SMEM
    act = jnp.where(a > 0, a, a * alpha)       # (H, W*C) f32

    # Zero-pad along H (W zero-padding is folded into the banded weights),
    # then one lane-dense matmul per kernel row, accumulated in f32.
    zrow = jnp.zeros((1, WC), jnp.float32)
    xp = jnp.concatenate([zrow, act, zrow], axis=0)        # (H + 2, W*C)
    acc = jnp.zeros((H, WC), jnp.float32)
    for ky in range(3):
        acc += jnp.dot(xp[ky:ky + H].astype(jnp.bfloat16), b_ref[ky],
                       preferred_element_type=jnp.float32)

    y_ref[0] = acc.astype(y_ref.dtype)

    # Per-image partial sums for the (global) BatchNorm batch statistics.
    s1 = jnp.sum(acc, axis=0, keepdims=True)
    s2 = jnp.sum(acc * acc, axis=0, keepdims=True)
    psum_ref[0] = jnp.concatenate([s1, s2], axis=0)        # (2, W*C)


def _act_conv_stage(x_img, scale_t, shift_t, alpha, b_mats):
    """x_img: (N, H, W*C).  Returns (conv output bf16 (N,H,W*C),
    per-image BN partial sums f32 (N, 2, W*C))."""
    N, H, WC = x_img.shape
    return pl.pallas_call(
        _act_conv_kernel,
        grid=(N,),
        in_specs=[
            pl.BlockSpec((1, H, WC), lambda n: (n, 0, 0)),   # one image / step
            pl.BlockSpec((1, WC), lambda n: (0, 0)),         # folded BN scale
            pl.BlockSpec((1, WC), lambda n: (0, 0)),         # folded BN shift
            pl.BlockSpec(memory_space=pltpu.MemorySpace.SMEM),  # PReLU alpha
            pl.BlockSpec((3, WC, WC), lambda n: (0, 0, 0)),  # banded weights
        ],
        out_specs=[
            pl.BlockSpec((1, H, WC), lambda n: (n, 0, 0)),
            pl.BlockSpec((1, 2, WC), lambda n: (n, 0, 0)),
        ],
        out_shape=[
            jax.ShapeDtypeStruct((N, H, WC), jnp.bfloat16),
            jax.ShapeDtypeStruct((N, 2, WC), jnp.float32),
        ],
        compiler_params=pltpu.CompilerParams(
            dimension_semantics=("parallel",)),
    )(x_img, scale_t, shift_t, alpha, b_mats)


# ---------------------------------------------------------------------------
# Kernel B: final BN2 (folded scale/shift) + residual add, tiled over rows.
# ---------------------------------------------------------------------------
def _bn_residual_kernel(x_ref, y_ref, scale_ref, shift_ref, out_ref):
    out_ref[...] = (x_ref[...]
                    + y_ref[...].astype(jnp.float32) * scale_ref[...]
                    + shift_ref[...])


def _bn_residual_add(x_flat, y_flat, scale_t, shift_t, tile_rows=8):
    R, WC = x_flat.shape
    if R % tile_rows != 0:
        tile_rows = R          # fall back to a single full block
    # For large inputs tile_rows would be raised toward the VMEM budget; at
    # demo scale 8 rows/step keeps a multi-step pipelined grid.
    return pl.pallas_call(
        _bn_residual_kernel,
        grid=(R // tile_rows,),
        in_specs=[
            pl.BlockSpec((tile_rows, WC), lambda i: (i, 0)),
            pl.BlockSpec((tile_rows, WC), lambda i: (i, 0)),
            pl.BlockSpec((1, WC), lambda i: (0, 0)),
            pl.BlockSpec((1, WC), lambda i: (0, 0)),
        ],
        out_specs=pl.BlockSpec((tile_rows, WC), lambda i: (i, 0)),
        out_shape=jax.ShapeDtypeStruct((R, WC), jnp.float32),
        compiler_params=pltpu.CompilerParams(
            dimension_semantics=("parallel",)),
    )(x_flat, y_flat, scale_t, shift_t)


# ---------------------------------------------------------------------------
# Wrapper-side helpers (tiny tensors; run as ordinary XLA ops).
# ---------------------------------------------------------------------------
def _banded_weights(w_oihw, width):
    """OIHW 3x3 conv weights -> (3, W*Cin, W*Cout) bf16 banded matrices.
    Zero padding along W is folded in (out-of-range taps are dropped)."""
    mats = []
    for ky in range(3):
        c_in = w_oihw.shape[1]
        c_out = w_oihw.shape[0]
        m = jnp.zeros((width * c_in, width * c_out), jnp.float32)
        for kx in range(3):
            tap = jnp.transpose(w_oihw[:, :, ky, kx])        # (Cin, Cout)
            band = jnp.eye(width, width, k=1 - kx, dtype=jnp.float32)
            m = m + jnp.kron(band, tap)
        mats.append(m)
    return jnp.stack(mats).astype(jnp.bfloat16)


def _fold_bn(psums, gamma, beta, count, width, eps=1e-5):
    """Reduce per-image partial sums -> folded BN (scale, shift), lane-tiled."""
    c = gamma.shape[0]
    s = jnp.sum(psums, axis=0).reshape(2, width, c).sum(axis=1)   # (2, C)
    mean = s[0] / count
    var = s[1] / count - mean * mean          # biased batch variance (training mode)
    scale = gamma * jax.lax.rsqrt(var + eps)
    shift = beta - mean * scale
    scale_t = jnp.tile(scale, width)[None, :].astype(jnp.float32)  # (1, W*C)
    shift_t = jnp.tile(shift, width)[None, :].astype(jnp.float32)
    return scale_t, shift_t


def residual_block(x_nchw, params):
    """ResidualBlock forward: x + bn2(conv2(prelu(bn1(conv1(x)))))."""
    n, c, h, w = x_nchw.shape
    wc = w * c
    count = n * h * w

    # NCHW -> lane-dense (N, H, W*C); channels are fastest on the lane axis.
    x = jnp.transpose(x_nchw, (0, 2, 3, 1)).reshape(n, h, wc).astype(jnp.float32)

    b1 = _banded_weights(params["w1"], w)
    b2 = _banded_weights(params["w2"], w)

    ones = jnp.ones((1, wc), jnp.float32)
    zeros = jnp.zeros((1, wc), jnp.float32)
    ident_alpha = jnp.ones((1,), jnp.float32)
    alpha = jnp.reshape(params["alpha"], (1,)).astype(jnp.float32)

    # Stage 1: conv1 + BN1 partial statistics.
    y1, ps1 = _act_conv_stage(x, ones, zeros, ident_alpha, b1)
    scale1, shift1 = _fold_bn(ps1, params["g1"], params["b1"], count, w)

    # Stage 2: BN1 + PReLU + conv2 + BN2 partial statistics (fused).
    y2, ps2 = _act_conv_stage(y1, scale1, shift1, alpha, b2)
    scale2, shift2 = _fold_bn(ps2, params["g2"], params["b2"], count, w)

    # Stage 3: BN2 + residual add, row-tiled.
    out_flat = _bn_residual_add(x.reshape(n * h, wc),
                                y2.reshape(n * h, wc), scale2, shift2)
    out = out_flat.reshape(n, h, w, c)
    return jnp.transpose(out, (0, 3, 1, 2))                  # back to NCHW


# ---------------------------------------------------------------------------
# Parameter init (matching nn.Conv2d / BatchNorm2d / PReLU conventions) and a
# plain-JAX reference of the PyTorch forward for the correctness check.
# ---------------------------------------------------------------------------
def init_params(key, channels):
    k1, k2, k3, k4, k5, k6 = jax.random.split(key, 6)
    bound = 1.0 / math.sqrt(channels * 9)     # kaiming_uniform_(a=sqrt(5)) bound
    params = dict(
        w1=jax.random.uniform(k1, (channels, channels, 3, 3), jnp.float32, -bound, bound),
        w2=jax.random.uniform(k2, (channels, channels, 3, 3), jnp.float32, -bound, bound),
        # perturb gamma/beta away from the (1, 0) defaults to exercise the affine path
        g1=1.0 + 0.1 * jax.random.normal(k3, (channels,), jnp.float32),
        b1=0.1 * jax.random.normal(k4, (channels,), jnp.float32),
        g2=1.0 + 0.1 * jax.random.normal(k5, (channels,), jnp.float32),
        b2=0.1 * jax.random.normal(k6, (channels,), jnp.float32),
        alpha=jnp.full((1,), 0.25, jnp.float32),   # PReLU default
    )
    return params


def reference_forward(x, params):
    def conv(v, wgt):
        return jax.lax.conv_general_dilated(
            v, wgt, (1, 1), ((1, 1), (1, 1)),
            dimension_numbers=("NCHW", "OIHW", "NCHW"))

    def bn(v, g, b):
        m = jnp.mean(v, axis=(0, 2, 3), keepdims=True)
        var = jnp.mean((v - m) ** 2, axis=(0, 2, 3), keepdims=True)
        return ((v - m) * jax.lax.rsqrt(var + 1e-5) * g.reshape(1, -1, 1, 1)
                + b.reshape(1, -1, 1, 1))

    r = bn(conv(x, params["w1"]), params["g1"], params["b1"])
    r = jnp.where(r > 0, r, params["alpha"].reshape(()) * r)
    r = bn(conv(r, params["w2"]), params["g2"], params["b2"])
    return x + r


if __name__ == "__main__":
    N, C, H, W = 2, 8, 16, 16        # W * C = 128 -> exactly one lane tile
    key = jax.random.PRNGKey(0)
    kx, kp = jax.random.split(key)
    x = jax.random.normal(kx, (N, C, H, W), jnp.float32)
    params = init_params(kp, C)

    out = jax.jit(residual_block)(x, params)
    out = jax.block_until_ready(out)

    ref = reference_forward(x, params)
    assert out.shape == x.shape and out.dtype == x.dtype
    max_err = float(jnp.max(jnp.abs(out - ref)))
    assert max_err < 5e-2, f"max abs error too large: {max_err}"
    print("KERNEL_OK")
</pallas_src>

<mosaic_0001>
module attributes {stable_mosaic.version = 11 : i64} {
  func.func @_act_conv_kernel(%arg0: i32, %arg1: memref<1x16x128xf32, #tpu.memory_space<vmem>>, %arg2: memref<1x128xf32, #tpu.memory_space<vmem>>, %arg3: memref<1x128xf32, #tpu.memory_space<vmem>>, %arg4: memref<1xf32, #tpu.memory_space<smem>>, %arg5: memref<3x128x128xbf16, #tpu.memory_space<vmem>>, %arg6: memref<1x16x128xbf16, #tpu.memory_space<vmem>>, %arg7: memref<1x2x128xf32, #tpu.memory_space<vmem>>) attributes {dimension_semantics = [#tpu.dimension_semantics<parallel>], iteration_bounds = array<i64: 2>, scalar_prefetch = 0 : i64, scratch_operands = 0 : i64, tpu.core_type = #tpu.core_type<tc>, window_params = [{transform_indices = @transform_0, window_bounds = array<i64: 1, 16, 128>}, {pipeline_mode = #tpu.pipeline_mode<synchronous>, transform_indices = @transform_1, window_bounds = array<i64: 1, 128>}, {pipeline_mode = #tpu.pipeline_mode<synchronous>, transform_indices = @transform_2, window_bounds = array<i64: 1, 128>}, {transform_indices = @transform_3, window_bounds = array<i64: 1>}, {pipeline_mode = #tpu.pipeline_mode<synchronous>, transform_indices = @transform_4, window_bounds = array<i64: 3, 128, 128>}, {transform_indices = @transform_5, window_bounds = array<i64: 1, 16, 128>}, {transform_indices = @transform_6, window_bounds = array<i64: 1, 2, 128>}]} {
    %c0 = arith.constant 0 : index
    %c0_0 = arith.constant 0 : index
    %c0_1 = arith.constant 0 : index
    %0 = vector.load %arg1[%c0, %c0_0, %c0_1] : memref<1x16x128xf32, #tpu.memory_space<vmem>>, vector<1x16x128xf32>
    %1 = vector.shape_cast %0 : vector<1x16x128xf32> to vector<16x128xf32>
    %c0_2 = arith.constant 0 : index
    %c0_3 = arith.constant 0 : index
    %2 = vector.load %arg2[%c0_2, %c0_3] : memref<1x128xf32, #tpu.memory_space<vmem>>, vector<1x128xf32>
    %3 = vector.broadcast %2 : vector<1x128xf32> to vector<16x128xf32>
    %4 = arith.mulf %1, %3 : vector<16x128xf32>
    %c0_4 = arith.constant 0 : index
    %c0_5 = arith.constant 0 : index
    %5 = vector.load %arg3[%c0_4, %c0_5] : memref<1x128xf32, #tpu.memory_space<vmem>>, vector<1x128xf32>
    %6 = vector.broadcast %5 : vector<1x128xf32> to vector<16x128xf32>
    %7 = arith.addf %4, %6 : vector<16x128xf32>
    %c0_6 = arith.constant 0 : index
    %8 = memref.load %arg4[%c0_6] : memref<1xf32, #tpu.memory_space<smem>>
    %cst = arith.constant 0.000000e+00 : f32
    %9 = vector.broadcast %cst : f32 to vector<16x128xf32>
    %10 = arith.cmpf ogt, %7, %9 : vector<16x128xf32>
    %11 = vector.broadcast %8 : f32 to vector<16x128xf32>
    %12 = arith.mulf %7, %11 : vector<16x128xf32>
    %13 = arith.select %10, %7, %12 : vector<16x128xi1>, vector<16x128xf32>
    %cst_7 = arith.constant 0.000000e+00 : f32
    %14 = vector.broadcast %cst_7 : f32 to vector<1x128xf32>
    %15 = tpu.concatenate %14, %13, %14 in 0 : vector<1x128xf32>, vector<16x128xf32>, vector<1x128xf32> -> vector<18x128xf32>
    %cst_8 = arith.constant 0.000000e+00 : f32
    %16 = vector.broadcast %cst_8 : f32 to vector<16x128xf32>
    %17 = vector.extract_strided_slice %15 {offsets = [0, 0], sizes = [16, 128], strides = [1, 1]} : vector<18x128xf32> to vector<16x128xf32>
    %18 = arith.truncf %17 : vector<16x128xf32> to vector<16x128xbf16>
    %c0_9 = arith.constant 0 : index
    %c0_10 = arith.constant 0 : index
    %c0_11 = arith.constant 0 : index
    %19 = vector.load %arg5[%c0_9, %c0_10, %c0_11] : memref<3x128x128xbf16, #tpu.memory_space<vmem>>, vector<1x128x128xbf16>
    %20 = vector.shape_cast %19 : vector<1x128x128xbf16> to vector<128x128xbf16>
    %cst_12 = arith.constant dense<0.000000e+00> : vector<16x128xf32>
    %21 = tpu.matmul %18, %20, %cst_12 {dimension_numbers = #tpu.dot_dimension_numbers<[1], [0], [0], [1], [0, 0, 1, 1], [], []>} : vector<16x128xbf16>, vector<128x128xbf16>, vector<16x128xf32> -> vector<16x128xf32>
    %22 = arith.addf %16, %21 : vector<16x128xf32>
    %23 = vector.extract_strided_slice %15 {offsets = [1, 0], sizes = [16, 128], strides = [1, 1]} : vector<18x128xf32> to vector<16x128xf32>
    %24 = arith.truncf %23 : vector<16x128xf32> to vector<16x128xbf16>
    %c1 = arith.constant 1 : index
    %c0_13 = arith.constant 0 : index
    %c0_14 = arith.constant 0 : index
    %25 = vector.load %arg5[%c1, %c0_13, %c0_14] : memref<3x128x128xbf16, #tpu.memory_space<vmem>>, vector<1x128x128xbf16>
    %26 = vector.shape_cast %25 : vector<1x128x128xbf16> to vector<128x128xbf16>
    %cst_15 = arith.constant dense<0.000000e+00> : vector<16x128xf32>
    %27 = tpu.matmul %24, %26, %cst_15 {dimension_numbers = #tpu.dot_dimension_numbers<[1], [0], [0], [1], [0, 0, 1, 1], [], []>} : vector<16x128xbf16>, vector<128x128xbf16>, vector<16x128xf32> -> vector<16x128xf32>
    %28 = arith.addf %22, %27 : vector<16x128xf32>
    %29 = vector.extract_strided_slice %15 {offsets = [2, 0], sizes = [16, 128], strides = [1, 1]} : vector<18x128xf32> to vector<16x128xf32>
    %30 = arith.truncf %29 : vector<16x128xf32> to vector<16x128xbf16>
    %c2 = arith.constant 2 : index
    %c0_16 = arith.constant 0 : index
    %c0_17 = arith.constant 0 : index
    %31 = vector.load %arg5[%c2, %c0_16, %c0_17] : memref<3x128x128xbf16, #tpu.memory_space<vmem>>, vector<1x128x128xbf16>
    %32 = vector.shape_cast %31 : vector<1x128x128xbf16> to vector<128x128xbf16>
    %cst_18 = arith.constant dense<0.000000e+00> : vector<16x128xf32>
    %33 = tpu.matmul %30, %32, %cst_18 {dimension_numbers = #tpu.dot_dimension_numbers<[1], [0], [0], [1], [0, 0, 1, 1], [], []>} : vector<16x128xbf16>, vector<128x128xbf16>, vector<16x128xf32> -> vector<16x128xf32>
    %34 = arith.addf %28, %33 : vector<16x128xf32>
    %35 = arith.truncf %34 : vector<16x128xf32> to vector<16x128xbf16>
    %c0_19 = arith.constant 0 : index
    %c0_20 = arith.constant 0 : index
    %c0_21 = arith.constant 0 : index
    %36 = vector.load %arg6[%c0_19, %c0_20, %c0_21] : memref<1x16x128xbf16, #tpu.memory_space<vmem>>, vector<1x16x128xbf16>
    %37 = vector.shape_cast %36 : vector<1x16x128xbf16> to vector<16x128xbf16>
    %38 = vector.shape_cast %35 : vector<16x128xbf16> to vector<1x16x128xbf16>
    tpu.vector_store %arg6[%c0_19, %c0_20, %c0_21], %38 {strides = array<i32>} : memref<1x16x128xbf16, #tpu.memory_space<vmem>>, vector<1x16x128xbf16>,
    %cst_22 = arith.constant dense<0.000000e+00> : vector<128xf32>
    %39 = vector.multi_reduction <add>, %34, %cst_22 [0] : vector<16x128xf32> to vector<128xf32>
    %40 = vector.shape_cast %39 : vector<128xf32> to vector<1x128xf32>
    %41 = arith.mulf %34, %34 : vector<16x128xf32>
    %cst_23 = arith.constant dense<0.000000e+00> : vector<128xf32>
    %42 = vector.multi_reduction <add>, %41, %cst_23 [0] : vector<16x128xf32> to vector<128xf32>
    %43 = vector.shape_cast %42 : vector<128xf32> to vector<1x128xf32>
    %44 = tpu.concatenate %40, %43 in 0 : vector<1x128xf32>, vector<1x128xf32> -> vector<2x128xf32>
    %c0_24 = arith.constant 0 : index
    %c0_25 = arith.constant 0 : index
    %c0_26 = arith.constant 0 : index
    %45 = vector.load %arg7[%c0_24, %c0_25, %c0_26] : memref<1x2x128xf32, #tpu.memory_space<vmem>>, vector<1x2x128xf32>
    %46 = vector.shape_cast %45 : vector<1x2x128xf32> to vector<2x128xf32>
    %47 = vector.shape_cast %44 : vector<2x128xf32> to vector<1x2x128xf32>
    tpu.vector_store %arg7[%c0_24, %c0_25, %c0_26], %47 {strides = array<i32>} : memref<1x2x128xf32, #tpu.memory_space<vmem>>, vector<1x2x128xf32>,
    return
  }
  func.func @transform_0(%arg0: i32) -> (i32, i32, i32) {
    %c0_i32 = arith.constant 0 : i32
    %c0_i32_0 = arith.constant 0 : i32
    %c0_i32_1 = arith.constant 0 : i32
    return %arg0, %c0_i32, %c0_i32_0 : i32, i32, i32
  }
  func.func @transform_1(%arg0: i32) -> (i32, i32) {
    %c0_i32 = arith.constant 0 : i32
    %c0_i32_0 = arith.constant 0 : i32
    %c0_i32_1 = arith.constant 0 : i32
    return %c0_i32, %c0_i32_0 : i32, i32
  }
  func.func @transform_2(%arg0: i32) -> (i32, i32) {
    %c0_i32 = arith.constant 0 : i32
    %c0_i32_0 = arith.constant 0 : i32
    %c0_i32_1 = arith.constant 0 : i32
    return %c0_i32, %c0_i32_0 : i32, i32
  }
  func.func @transform_3(%arg0: i32) -> i32 {
    %c0_i32 = arith.constant 0 : i32
    %c0_i32_0 = arith.constant 0 : i32
    return %c0_i32 : i32
  }
  func.func @transform_4(%arg0: i32) -> (i32, i32, i32) {
    %c0_i32 = arith.constant 0 : i32
    %c0_i32_0 = arith.constant 0 : i32
    %c0_i32_1 = arith.constant 0 : i32
    %c0_i32_2 = arith.constant 0 : i32
    return %c0_i32, %c0_i32_0, %c0_i32_1 : i32, i32, i32
  }
  func.func @transform_5(%arg0: i32) -> (i32, i32, i32) {
    %c0_i32 = arith.constant 0 : i32
    %c0_i32_0 = arith.constant 0 : i32
    %c0_i32_1 = arith.constant 0 : i32
    return %arg0, %c0_i32, %c0_i32_0 : i32, i32, i32
  }
  func.func @transform_6(%arg0: i32) -> (i32, i32, i32) {
    %c0_i32 = arith.constant 0 : i32
    %c0_i32_0 = arith.constant 0 : i32
    %c0_i32_1 = arith.constant 0 : i32
    return %arg0, %c0_i32, %c0_i32_0 : i32, i32, i32
  }
}

module attributes {stable_mosaic.version = 11 : i64} {
  func.func @_act_conv_kernel(%arg0: i32, %arg1: memref<1x16x128xbf16, #tpu.memory_space<vmem>>, %arg2: memref<1x128xf32, #tpu.memory_space<vmem>>, %arg3: memref<1x128xf32, #tpu.memory_space<vmem>>, %arg4: memref<1xf32, #tpu.memory_space<smem>>, %arg5: memref<3x128x128xbf16, #tpu.memory_space<vmem>>, %arg6: memref<1x16x128xbf16, #tpu.memory_space<vmem>>, %arg7: memref<1x2x128xf32, #tpu.memory_space<vmem>>) attributes {dimension_semantics = [#tpu.dimension_semantics<parallel>], iteration_bounds = array<i64: 2>, scalar_prefetch = 0 : i64, scratch_operands = 0 : i64, tpu.core_type = #tpu.core_type<tc>, window_params = [{transform_indices = @transform_0, window_bounds = array<i64: 1, 16, 128>}, {pipeline_mode = #tpu.pipeline_mode<synchronous>, transform_indices = @transform_1, window_bounds = array<i64: 1, 128>}, {pipeline_mode = #tpu.pipeline_mode<synchronous>, transform_indices = @transform_2, window_bounds = array<i64: 1, 128>}, {transform_indices = @transform_3, window_bounds = array<i64: 1>}, {pipeline_mode = #tpu.pipeline_mode<synchronous>, transform_indices = @transform_4, window_bounds = array<i64: 3, 128, 128>}, {transform_indices = @transform_5, window_bounds = array<i64: 1, 16, 128>}, {transform_indices = @transform_6, window_bounds = array<i64: 1, 2, 128>}]} {
    %c0 = arith.constant 0 : index
    %c0_0 = arith.constant 0 : index
    %c0_1 = arith.constant 0 : index
    %0 = vector.load %arg1[%c0, %c0_0, %c0_1] : memref<1x16x128xbf16, #tpu.memory_space<vmem>>, vector<1x16x128xbf16>
    %1 = vector.shape_cast %0 : vector<1x16x128xbf16> to vector<16x128xbf16>
    %2 = arith.extf %1 : vector<16x128xbf16> to vector<16x128xf32>
    %c0_2 = arith.constant 0 : index
    %c0_3 = arith.constant 0 : index
    %3 = vector.load %arg2[%c0_2, %c0_3] : memref<1x128xf32, #tpu.memory_space<vmem>>, vector<1x128xf32>
    %4 = vector.broadcast %3 : vector<1x128xf32> to vector<16x128xf32>
    %5 = arith.mulf %2, %4 : vector<16x128xf32>
    %c0_4 = arith.constant 0 : index
    %c0_5 = arith.constant 0 : index
    %6 = vector.load %arg3[%c0_4, %c0_5] : memref<1x128xf32, #tpu.memory_space<vmem>>, vector<1x128xf32>
    %7 = vector.broadcast %6 : vector<1x128xf32> to vector<16x128xf32>
    %8 = arith.addf %5, %7 : vector<16x128xf32>
    %c0_6 = arith.constant 0 : index
    %9 = memref.load %arg4[%c0_6] : memref<1xf32, #tpu.memory_space<smem>>
    %cst = arith.constant 0.000000e+00 : f32
    %10 = vector.broadcast %cst : f32 to vector<16x128xf32>
    %11 = arith.cmpf ogt, %8, %10 : vector<16x128xf32>
    %12 = vector.broadcast %9 : f32 to vector<16x128xf32>
    %13 = arith.mulf %8, %12 : vector<16x128xf32>
    %14 = arith.select %11, %8, %13 : vector<16x128xi1>, vector<16x128xf32>
    %cst_7 = arith.constant 0.000000e+00 : f32
    %15 = vector.broadcast %cst_7 : f32 to vector<1x128xf32>
    %16 = tpu.concatenate %15, %14, %15 in 0 : vector<1x128xf32>, vector<16x128xf32>, vector<1x128xf32> -> vector<18x128xf32>
    %cst_8 = arith.constant 0.000000e+00 : f32
    %17 = vector.broadcast %cst_8 : f32 to vector<16x128xf32>
    %18 = vector.extract_strided_slice %16 {offsets = [0, 0], sizes = [16, 128], strides = [1, 1]} : vector<18x128xf32> to vector<16x128xf32>
    %19 = arith.truncf %18 : vector<16x128xf32> to vector<16x128xbf16>
    %c0_9 = arith.constant 0 : index
    %c0_10 = arith.constant 0 : index
    %c0_11 = arith.constant 0 : index
    %20 = vector.load %arg5[%c0_9, %c0_10, %c0_11] : memref<3x128x128xbf16, #tpu.memory_space<vmem>>, vector<1x128x128xbf16>
    %21 = vector.shape_cast %20 : vector<1x128x128xbf16> to vector<128x128xbf16>
    %cst_12 = arith.constant dense<0.000000e+00> : vector<16x128xf32>
    %22 = tpu.matmul %19, %21, %cst_12 {dimension_numbers = #tpu.dot_dimension_numbers<[1], [0], [0], [1], [0, 0, 1, 1], [], []>} : vector<16x128xbf16>, vector<128x128xbf16>, vector<16x128xf32> -> vector<16x128xf32>
    %23 = arith.addf %17, %22 : vector<16x128xf32>
    %24 = vector.extract_strided_slice %16 {offsets = [1, 0], sizes = [16, 128], strides = [1, 1]} : vector<18x128xf32> to vector<16x128xf32>
    %25 = arith.truncf %24 : vector<16x128xf32> to vector<16x128xbf16>
    %c1 = arith.constant 1 : index
    %c0_13 = arith.constant 0 : index
    %c0_14 = arith.constant 0 : index
    %26 = vector.load %arg5[%c1, %c0_13, %c0_14] : memref<3x128x128xbf16, #tpu.memory_space<vmem>>, vector<1x128x128xbf16>
    %27 = vector.shape_cast %26 : vector<1x128x128xbf16> to vector<128x128xbf16>
    %cst_15 = arith.constant dense<0.000000e+00> : vector<16x128xf32>
    %28 = tpu.matmul %25, %27, %cst_15 {dimension_numbers = #tpu.dot_dimension_numbers<[1], [0], [0], [1], [0, 0, 1, 1], [], []>} : vector<16x128xbf16>, vector<128x128xbf16>, vector<16x128xf32> -> vector<16x128xf32>
    %29 = arith.addf %23, %28 : vector<16x128xf32>
    %30 = vector.extract_strided_slice %16 {offsets = [2, 0], sizes = [16, 128], strides = [1, 1]} : vector<18x128xf32> to vector<16x128xf32>
    %31 = arith.truncf %30 : vector<16x128xf32> to vector<16x128xbf16>
    %c2 = arith.constant 2 : index
    %c0_16 = arith.constant 0 : index
    %c0_17 = arith.constant 0 : index
    %32 = vector.load %arg5[%c2, %c0_16, %c0_17] : memref<3x128x128xbf16, #tpu.memory_space<vmem>>, vector<1x128x128xbf16>
    %33 = vector.shape_cast %32 : vector<1x128x128xbf16> to vector<128x128xbf16>
    %cst_18 = arith.constant dense<0.000000e+00> : vector<16x128xf32>
    %34 = tpu.matmul %31, %33, %cst_18 {dimension_numbers = #tpu.dot_dimension_numbers<[1], [0], [0], [1], [0, 0, 1, 1], [], []>} : vector<16x128xbf16>, vector<128x128xbf16>, vector<16x128xf32> -> vector<16x128xf32>
    %35 = arith.addf %29, %34 : vector<16x128xf32>
    %36 = arith.truncf %35 : vector<16x128xf32> to vector<16x128xbf16>
    %c0_19 = arith.constant 0 : index
    %c0_20 = arith.constant 0 : index
    %c0_21 = arith.constant 0 : index
    %37 = vector.load %arg6[%c0_19, %c0_20, %c0_21] : memref<1x16x128xbf16, #tpu.memory_space<vmem>>, vector<1x16x128xbf16>
    %38 = vector.shape_cast %37 : vector<1x16x128xbf16> to vector<16x128xbf16>
    %39 = vector.shape_cast %36 : vector<16x128xbf16> to vector<1x16x128xbf16>
    tpu.vector_store %arg6[%c0_19, %c0_20, %c0_21], %39 {strides = array<i32>} : memref<1x16x128xbf16, #tpu.memory_space<vmem>>, vector<1x16x128xbf16>,
    %cst_22 = arith.constant dense<0.000000e+00> : vector<128xf32>
    %40 = vector.multi_reduction <add>, %35, %cst_22 [0] : vector<16x128xf32> to vector<128xf32>
    %41 = vector.shape_cast %40 : vector<128xf32> to vector<1x128xf32>
    %42 = arith.mulf %35, %35 : vector<16x128xf32>
    %cst_23 = arith.constant dense<0.000000e+00> : vector<128xf32>
    %43 = vector.multi_reduction <add>, %42, %cst_23 [0] : vector<16x128xf32> to vector<128xf32>
    %44 = vector.shape_cast %43 : vector<128xf32> to vector<1x128xf32>
    %45 = tpu.concatenate %41, %44 in 0 : vector<1x128xf32>, vector<1x128xf32> -> vector<2x128xf32>
    %c0_24 = arith.constant 0 : index
    %c0_25 = arith.constant 0 : index
    %c0_26 = arith.constant 0 : index
    %46 = vector.load %arg7[%c0_24, %c0_25, %c0_26] : memref<1x2x128xf32, #tpu.memory_space<vmem>>, vector<1x2x128xf32>
    %47 = vector.shape_cast %46 : vector<1x2x128xf32> to vector<2x128xf32>
    %48 = vector.shape_cast %45 : vector<2x128xf32> to vector<1x2x128xf32>
    tpu.vector_store %arg7[%c0_24, %c0_25, %c0_26], %48 {strides = array<i32>} : memref<1x2x128xf32, #tpu.memory_space<vmem>>, vector<1x2x128xf32>,
    return
  }
  func.func @transform_0(%arg0: i32) -> (i32, i32, i32) {
    %c0_i32 = arith.constant 0 : i32
    %c0_i32_0 = arith.constant 0 : i32
    %c0_i32_1 = arith.constant 0 : i32
    return %arg0, %c0_i32, %c0_i32_0 : i32, i32, i32
  }
  func.func @transform_1(%arg0: i32) -> (i32, i32) {
    %c0_i32 = arith.constant 0 : i32
    %c0_i32_0 = arith.constant 0 : i32
    %c0_i32_1 = arith.constant 0 : i32
    return %c0_i32, %c0_i32_0 : i32, i32
  }
  func.func @transform_2(%arg0: i32) -> (i32, i32) {
    %c0_i32 = arith.constant 0 : i32
    %c0_i32_0 = arith.constant 0 : i32
    %c0_i32_1 = arith.constant 0 : i32
    return %c0_i32, %c0_i32_0 : i32, i32
  }
  func.func @transform_3(%arg0: i32) -> i32 {
    %c0_i32 = arith.constant 0 : i32
    %c0_i32_0 = arith.constant 0 : i32
    return %c0_i32 : i32
  }
  func.func @transform_4(%arg0: i32) -> (i32, i32, i32) {
    %c0_i32 = arith.constant 0 : i32
    %c0_i32_0 = arith.constant 0 : i32
    %c0_i32_1 = arith.constant 0 : i32
    %c0_i32_2 = arith.constant 0 : i32
    return %c0_i32, %c0_i32_0, %c0_i32_1 : i32, i32, i32
  }
  func.func @transform_5(%arg0: i32) -> (i32, i32, i32) {
    %c0_i32 = arith.constant 0 : i32
    %c0_i32_0 = arith.constant 0 : i32
    %c0_i32_1 = arith.constant 0 : i32
    return %arg0, %c0_i32, %c0_i32_0 : i32, i32, i32
  }
  func.func @transform_6(%arg0: i32) -> (i32, i32, i32) {
    %c0_i32 = arith.constant 0 : i32
    %c0_i32_0 = arith.constant 0 : i32
    %c0_i32_1 = arith.constant 0 : i32
    return %arg0, %c0_i32, %c0_i32_0 : i32, i32, i32
  }
}

module attributes {stable_mosaic.version = 11 : i64} {
  func.func @_bn_residual_kernel(%arg0: i32, %arg1: memref<8x128xf32, #tpu.memory_space<vmem>>, %arg2: memref<8x128xbf16, #tpu.memory_space<vmem>>, %arg3: memref<1x128xf32, #tpu.memory_space<vmem>>, %arg4: memref<1x128xf32, #tpu.memory_space<vmem>>, %arg5: memref<8x128xf32, #tpu.memory_space<vmem>>) attributes {dimension_semantics = [#tpu.dimension_semantics<parallel>], iteration_bounds = array<i64: 4>, scalar_prefetch = 0 : i64, scratch_operands = 0 : i64, tpu.core_type = #tpu.core_type<tc>, window_params = [{transform_indices = @transform_0, window_bounds = array<i64: 8, 128>}, {transform_indices = @transform_1, window_bounds = array<i64: 8, 128>}, {pipeline_mode = #tpu.pipeline_mode<synchronous>, transform_indices = @transform_2, window_bounds = array<i64: 1, 128>}, {pipeline_mode = #tpu.pipeline_mode<synchronous>, transform_indices = @transform_3, window_bounds = array<i64: 1, 128>}, {transform_indices = @transform_4, window_bounds = array<i64: 8, 128>}]} {
    %c0 = arith.constant 0 : index
    %c0_0 = arith.constant 0 : index
    %0 = vector.load %arg1[%c0, %c0_0] : memref<8x128xf32, #tpu.memory_space<vmem>>, vector<8x128xf32>
    %c0_1 = arith.constant 0 : index
    %c0_2 = arith.constant 0 : index
    %1 = vector.load %arg2[%c0_1, %c0_2] : memref<8x128xbf16, #tpu.memory_space<vmem>>, vector<8x128xbf16>
    %2 = arith.extf %1 : vector<8x128xbf16> to vector<8x128xf32>
    %c0_3 = arith.constant 0 : index
    %c0_4 = arith.constant 0 : index
    %3 = vector.load %arg3[%c0_3, %c0_4] : memref<1x128xf32, #tpu.memory_space<vmem>>, vector<1x128xf32>
    %4 = vector.broadcast %3 : vector<1x128xf32> to vector<8x128xf32>
    %5 = arith.mulf %2, %4 : vector<8x128xf32>
    %6 = arith.addf %0, %5 : vector<8x128xf32>
    %c0_5 = arith.constant 0 : index
    %c0_6 = arith.constant 0 : index
    %7 = vector.load %arg4[%c0_5, %c0_6] : memref<1x128xf32, #tpu.memory_space<vmem>>, vector<1x128xf32>
    %8 = vector.broadcast %7 : vector<1x128xf32> to vector<8x128xf32>
    %9 = arith.addf %6, %8 : vector<8x128xf32>
    %c0_7 = arith.constant 0 : index
    %c0_8 = arith.constant 0 : index
    %10 = vector.load %arg5[%c0_7, %c0_8] : memref<8x128xf32, #tpu.memory_space<vmem>>, vector<8x128xf32>
    tpu.vector_store %arg5[%c0_7, %c0_8], %9 {strides = array<i32>} : memref<8x128xf32, #tpu.memory_space<vmem>>, vector<8x128xf32>,
    return
  }
  func.func @transform_0(%arg0: i32) -> (i32, i32) {
    %c0_i32 = arith.constant 0 : i32
    %c0_i32_0 = arith.constant 0 : i32
    return %arg0, %c0_i32 : i32, i32
  }
  func.func @transform_1(%arg0: i32) -> (i32, i32) {
    %c0_i32 = arith.constant 0 : i32
    %c0_i32_0 = arith.constant 0 : i32
    return %arg0, %c0_i32 : i32, i32
  }
  func.func @transform_2(%arg0: i32) -> (i32, i32) {
    %c0_i32 = arith.constant 0 : i32
    %c0_i32_0 = arith.constant 0 : i32
    %c0_i32_1 = arith.constant 0 : i32
    return %c0_i32, %c0_i32_0 : i32, i32
  }
  func.func @transform_3(%arg0: i32) -> (i32, i32) {
    %c0_i32 = arith.constant 0 : i32
    %c0_i32_0 = arith.constant 0 : i32
    %c0_i32_1 = arith.constant 0 : i32
    return %c0_i32, %c0_i32_0 : i32, i32
  }
  func.func @transform_4(%arg0: i32) -> (i32, i32) {
    %c0_i32 = arith.constant 0 : i32
    %c0_i32_0 = arith.constant 0 : i32
    return %arg0, %c0_i32 : i32, i32
  }
}

</mosaic_0001>

<bundles_post_ra>
// kernel: residual_block.3
= control target key start
LH: loop header
LB: loop body
LE: loop exit
PB: predicated region body
PF: predicated region fallthrough
CT: control target
= control target key end

     0   :  { %s1016_s23 = smov 0   ;;  %s1154_s0 = inlined_call_operand.vmem [shape: f32[2,16,128], index: 0, kind: input, shape index: {}]   ;;  %s1155_s1 = inlined_call_operand.vmem [shape: f32[1,128], index: 1, kind: input, shape index: {}]   ;;  %s1156_s2 = inlined_call_operand.vmem [shape: f32[1,128], index: 2, kind: input, shape index: {}]   ;;  %s1157_s3 = inlined_call_operand.<no memory space> [shape: f32[1], index: 3, kind: input, shape index: {}]   ;;  %s1158_s4 = inlined_call_operand.vmem [shape: bf16[3,128,128], index: 4, kind: input, shape index: {}]   ;;  %s1159_s5 = inlined_call_operand.vmem [shape: bf16[2,16,128], index: 5, kind: output, shape index: {0}]   ;;  %s1160_s6 = inlined_call_operand.vmem [shape: f32[2,2,128], index: 6, kind: output, shape index: {1}]  }
   0x1   :  { %12 = sst [smem:[#allocation2]] %s1157_s3 }
   0x2 LB: > { %s760_s24 = sadd.s32 4294967295, %s973_s23   ;;  %p764_p0 = scmp.ge.s32.totalorder %s973_s23, 1  ;;  %s973_s23 = sphi %s1016_s23, %s18_s23  }
   0x3   : > { %p216_p1 = scmp.lt.s32.totalorder %s973_s23, 3 }
   0x5   : > { %p217_p2 = pnand %p764_p0, %p216_p1 }
   0x6   : > { %p250_p3 = scmp.lt.s32.totalorder (!%p217_p2), %s760_s24, 1  ;;  %s285_s27 = sld [smem:[#allocation2]] (!%p217_p2) }
   0x7   : > { %220 = sbr.rel (%p217_p2) target bundleno = 294 (0x126), region = 40 }
   0xc   : > { %v943_v0 = vld [vmem:[%s1158_s4 + $0x78] sm:$0xff]   ;;  %v975_v1 = vmov 0.0   ;;  %v945_v3 = vld [vmem:[%s1158_s4 + $0x70] sm:$0xff]   ;;  %vm976_vm0 = vmmov 0   ;;  %v947_v5 = vld [vmem:[%s1158_s4 + $0x68] sm:$0xff]   ;;  %s1162_s24 = smov (!%p250_p3, %s760_s24), 1  ;;  %v288_v22 = vstv %s285_s27 }
   0xd   : > { %872 = vmatprep.subr.bf16.mxu0 %v975_v1  ;;  %892 = vmatprep.subr.bf16.mxu1 %v975_v1  ;;  %v944_v2 = vld [vmem:[%s1158_s4 + $0x38] sm:$0xff]   ;;  %v946_v4 = vld [vmem:[%s1158_s4 + $0x30] sm:$0xff]   ;;  %v948_v6 = vld [vmem:[%s1158_s4 + $0x28] sm:$0xff]   ;;  %s836_s14 = sshll.u32 %s1162_s24, 4  ;;  %vm295_vm3 = vcmask 1040384   ;;  %vm977_vm5 = vmmov 1  }
   0xe   : > { %873 = vmatpush3.bf16.msra.mxu0 %v943_v0  ;;  %888 = vmatprep.mubr.msk.bf16.mxu0 %vm976_vm0, %v975_v1  ;;  %v949_v7 = vld [vmem:[%s1158_s4 + $0x60] sm:$0xff]   ;;  %s254_s19 = scalar_lea.vmem %s1154_s0, %s836_s14  ;;  %v951_v9 = vld [vmem:[%s1158_s4 + $0x58] sm:$0xff]   ;;  %v953_v17 = vld [vmem:[%s1158_s4 + $0x50] sm:$0xff]   ;;  %vm339_vm7 = vsmask.f32 7424  ;;  %vm550_vm8 = vcmask 1046528  }
   0xf   : > { %893 = vmatpush3.bf16.msra.mxu1 %v944_v2  ;;  %874 = vmatprep.subr.bf16.mxu0 %v975_v1  ;;  %v950_v8 = vld [vmem:[%s1158_s4 + $0x20] sm:$0xff]   ;;  %v952_v10 = vld [vmem:[%s1158_s4 + $0x18] sm:$0xff]   ;;  %v266_v12 = vld [vmem:[%s254_s19 + $0x8] sm:$0xff]  ;;  %s837_s11 = sshll.u32 %s1162_s24, 3  ;;  %s769_s15 = sshll.u32 %s1162_s24, 1 }
  0x10   : > { %894 = vmatprep.subr.bf16.mxu1 %v975_v1  ;;  %908 = vmatprep.mubr.msk.bf16.mxu1 %vm976_vm0, %v975_v1  ;;  %v265_v11 = vld [vmem:[%s254_s19] sm:$0xff]  ;;  %v954_v18 = vld [vmem:[%s1158_s4 + $0x10] sm:$0xff]   ;;  %v955_v21 = vld [vmem:[%s1158_s4 + $0x48] sm:$0xff]   ;;  %s259_s14 = scalar_lea.vmem %s1159_s5, %s837_s11  ;;  %s263_s18 = scalar_lea.vmem %s1160_s6, %s769_s15 }
  0x11   : > { %v770_v13 = vld [vmem:[%s1155_s1] ss:$0 sm:$0xff]  ;;  %v956_v23 = vld [vmem:[%s1158_s4 + $0x8] sm:$0xff]   ;;  %vm804_vm4 = vmneg %vm295_vm3 }
  0x12   : > { %875 = vmatpush3.bf16.msra.mxu0 %v945_v3  ;;  %v274_v14 = vmul.f32 %v770_v13, %v265_v11  ;;  %v275_v15 = vmul.f32 %v770_v13, %v266_v12  ;;  %v771_v16 = vld [vmem:[%s1156_s2] ss:$0 sm:$0xff]  ;;  %vm805_vm6 = vmpackc.low %vm977_vm5, %vm804_vm4  ;;  %v959_v44 = vld [vmem:[%s1158_s4 + $0xb8] sm:$0xff]  }
  0x13   : > { %895 = vmatpush3.bf16.msra.mxu1 %v946_v4  ;;  %876 = vmatprep.subr.bf16.mxu0 %v975_v1  ;;  %v957_v28 = vld [vmem:[%s1158_s4 + $0x40] sm:$0xff]   ;;  %v960_v46 = vld [vmem:[%s1158_s4 + $0xb0] sm:$0xff]   ;;  %v961_v47 = vld [vmem:[%s1158_s4 + $0xa8] sm:$0xff]  }
  0x14   : > { %896 = vmatprep.subr.bf16.mxu1 %v975_v1  ;;  %v283_v19 = vadd.f32 %v771_v16, %v274_v14  ;;  %v284_v20 = vadd.f32 %v771_v16, %v275_v15  ;;  %v958_v31 = vld [vmem:[%s1158_s4] sm:$0xff]   ;;  %v963_v49 = vld [vmem:[%s1158_s4 + $0x98] sm:$0xff]   ;;  %v964_v50 = vld [vmem:[%s1158_s4 + $0x90] sm:$0xff]  }
  0x15   : > { %v962_v48 = vld [vmem:[%s1158_s4 + $0xa0] sm:$0xff]   ;;  %v965_v51 = vld [vmem:[%s1158_s4 + $0x88] sm:$0xff]  }
  0x16   : > { %877 = vmatpush3.bf16.msra.mxu0 %v947_v5  ;;  %vm286_vm1 = vcmp.gt.f32.partialorder %v283_v19, 0.0  ;;  %vm287_vm2 = vcmp.gt.f32.partialorder %v284_v20, 0.0  ;;  %v289_v24 = vmul.f32 %v288_v22, %v283_v19  ;;  %v290_v25 = vmul.f32 %v288_v22, %v284_v20  ;;  %v966_v52 = vld [vmem:[%s1158_s4 + $0x80] sm:$0xff]  }
  0x17   : > { %897 = vmatpush3.bf16.msra.mxu1 %v948_v6  ;;  %878 = vmatprep.subr.bf16.mxu0 %v975_v1 }
  0x18   : > { %898 = vmatprep.subr.bf16.mxu1 %v975_v1  ;;  %v291_v26 = vsel %vm286_vm1, %v283_v19, %v289_v24  ;;  %v292_v27 = vsel %vm287_vm2, %v284_v20, %v290_v25 }
  0x19   : > { %v296_v29 = vrot.slane %v291_v26, 7  ;;  %v297_v30 = vrot.slane %v292_v27, 7 }
  0x1a   : > { %879 = vmatpush3.bf16.msra.mxu0 %v949_v7 }
  0x1b   : > { %899 = vmatpush3.bf16.msra.mxu1 %v950_v8  ;;  %880 = vmatprep.subr.bf16.mxu0 %v975_v1  ;;  %v298_v32 = vsel %vm295_vm3, %v296_v29, %v297_v30  ;;  %v302_v33 = vsel %vm295_vm3, 0.0, %v296_v29  ;;  %v303_v34 = vsel %vm295_vm3, %v297_v30, 0.0 }
  0x1c   : > { %900 = vmatprep.subr.bf16.mxu1 %v975_v1  ;;  %v304_v35 = vpack.c.bf16 %v298_v32, %v302_v33  ;;  %v321_v36 = vpack.c.bf16 %v303_v34, %v303_v34  ;;  %v806_v37 = vpack.c.bf16 %v298_v32, %v296_v29 }
  0x1e   : > { %881 = vmatpush3.bf16.msra.mxu0 %v951_v9  ;;  %v341_v38 = vshrl.u32 %v304_v35, 16  ;;  %v343_v39 = vshll.u32 %v304_v35, 16  ;;  %v348_v40 = vshll.u32 %v321_v36, 16  ;;  %v551_v53 = vrot.slane %v304_v35, 1 }
  0x1f   : > { %901 = vmatpush3.bf16.msra.mxu1 %v952_v10  ;;  %882 = vmatprep.subr.bf16.mxu0 %v975_v1  ;;  %v552_v54 = vrot.slane %v321_v36, 1 }
  0x20   : > { %902 = vmatprep.subr.bf16.mxu1 %v975_v1  ;;  %v345_v41 = vrot.slane %v343_v39, 1  ;;  %v350_v42 = vrot.slane %v348_v40, 1 }
  0x21   : > { %v553_v55 = vsel %vm550_vm8, %v551_v53, %v552_v54 }
  0x22   : > { %883 = vmatpush3.bf16.msra.mxu0 %v953_v17  ;;  %v346_v43 = vor.u32 %v345_v41, %v341_v38 }
  0x23   : > { %903 = vmatpush3.bf16.msra.mxu1 %v954_v18  ;;  %884 = vmatprep.subr.bf16.mxu0 %v975_v1 }
  0x24   : > { %904 = vmatprep.subr.bf16.mxu1 %v975_v1  ;;  %v351_v45 = vsel %vm339_vm7, %v346_v43, %v350_v42 }
  0x26   : > { %885 = vmatpush3.bf16.msra.mxu0 %v955_v21 }
  0x27   : > { %905 = vmatpush3.bf16.msra.mxu1 %v956_v23  ;;  %886 = vmatprep.subr.bf16.mxu0 %v975_v1 }
  0x28   : > { %906 = vmatprep.subr.bf16.mxu1 %v975_v1 }
  0x2a   : > { %887 = vmatpush3.bf16.msra.mxu0 %v957_v28 }
  0x2b   : > { %907 = vmatpush3.bf16.msra.mxu1 %v958_v31  ;;  %912 = vmatprep.subr.bf16.mxu0 %v975_v1 }
  0x2d   : > { %889 = vmatmul.mubr.bf16.vlgmr.msra.gmra.mxu0 %v351_v45 }
  0x2e   : > { %909 = vmatmul.mubr.msk.bf16.vlgmr.msra.gmra.mxu1 %vm805_vm6, %v806_v37  ;;  %913 = vmatpush3.bf16.msra.mxu0 %v959_v44 }
  0x2f   : > { %928 = vmatprep.mubr.msk.bf16.mxu0 %vm976_vm0, %v975_v1  ;;  %914 = vmatprep.subr.bf16.mxu0 %v975_v1 }
  0x32   : > { %915 = vmatpush3.bf16.msra.mxu0 %v960_v46 }
  0x33   : > { %916 = vmatprep.subr.bf16.mxu0 %v975_v1 }
  0x36   : > { %917 = vmatpush3.bf16.msra.mxu0 %v961_v47 }
  0x37   : > { %918 = vmatprep.subr.bf16.mxu0 %v975_v1 }
  0x3a   : > { %919 = vmatpush3.bf16.msra.mxu0 %v962_v48 }
  0x3b   : > { %920 = vmatprep.subr.bf16.mxu0 %v975_v1 }
  0x3e   : > { %921 = vmatpush3.bf16.msra.mxu0 %v963_v49 }
  0x3f   : > { %922 = vmatprep.subr.bf16.mxu0 %v975_v1 }
  0x42   : > { %923 = vmatpush3.bf16.msra.mxu0 %v964_v50 }
  0x43   : > { %924 = vmatprep.subr.bf16.mxu0 %v975_v1 }
  0x46   : > { %925 = vmatpush3.bf16.msra.mxu0 %v965_v51 }
  0x47   : > { %926 = vmatprep.subr.bf16.mxu0 %v975_v1 }
  0x4a   : > { %927 = vmatpush3.bf16.msra.mxu0 %v966_v52 }
  0x4d   : > { %929 = vmatmul.mubr.bf16.vlgmr.msra.gmra.mxu0 %v553_v55 }
  0xed   : > { %v435_v58 = vpop.f32.mrf.mxu0 }
  0xee   : > { %v524_v56 = vpop.f32.mrf.mxu1 }
  0xef   : > { %v890_v60 = vpop.f32.mrf.mxu0  ;;  %v525_v2 = vadd.f32 %v524_v56, %v435_v58 }
  0xf0   : > { %v910_v57 = vpop.f32.mrf.mxu1 }
  0xf1   : > { %v438_v62 = vpop.f32.mrf.mxu0 }
  0xf2   : > { %v527_v59 = vpop.f32.mrf.mxu1 }
  0xf3   : > { %v891_v63 = vpop.f32.mrf.mxu0  ;;  %v528_v4 = vadd.f32 %v527_v59, %v438_v62 }
  0xf4   : > { %v911_v61 = vpop.f32.mrf.mxu1 }
 0x10d   : > { %v637_v0 = vpop.f32.mrf.mxu0 }
 0x10e   : > { %v644_v5 = vadd.f32 %v637_v0, %v525_v2 }
 0x10f   : > { %v930_v3 = vpop.f32.mrf.mxu0 }
 0x110   : > { %v663_v8 = vmul.f32 %v644_v5, %v644_v5 }
 0x111   : > { %v640_v1 = vpop.f32.mrf.mxu0 }
 0x112   : > { %v645_v6 = vadd.f32 %v640_v1, %v528_v4 }
 0x113   : > { %v931_v7 = vpop.f32.mrf.mxu0 }
 0x114   : > { %v843_v9 = vpack.c.bf16 %v645_v6, %v644_v5  ;;  %v656_v10 = vadd.f32 %v645_v6, %v644_v5  ;;  %v664_v11 = vmul.f32 %v645_v6, %v645_v6 }
 0x116   : > { %844 = vst [vmem:[%s259_s14] sm:$0xff] %v843_v9   ;;  %v657_v12 = vrot.slane %v656_v10, 4  ;;  %v665_v13 = vadd.f32 %v664_v11, %v663_v8 }
 0x118   : > { %v658_v14 = vadd.f32 %v657_v12, %v656_v10  ;;  %v666_v15 = vrot.slane %v665_v13, 4 }
 0x11a   : > { %v659_v16 = vrot.slane %v658_v14, 2  ;;  %v667_v17 = vadd.f32 %v666_v15, %v665_v13 }
 0x11c   : > { %v660_v18 = vadd.f32 %v659_v16, %v658_v14  ;;  %v668_v19 = vrot.slane %v667_v17, 2 }
 0x11e   : > { %v661_v20 = vrot.slane %v660_v18, 1  ;;  %v669_v21 = vadd.f32 %v668_v19, %v667_v17 }
 0x120   : > { %v670_v22 = vrot.slane %v669_v21, 1  ;;  %v662_v23 = vadd.f32 %v661_v20, %v660_v18 }
 0x122   : > { %v671_v24 = vadd.f32 %v670_v22, %v669_v21 }
 0x124   : > { %v672_v25 = vsel %vm295_vm3, %v662_v23, %v671_v24 }
 0x125   : > { %673 = vst [vmem:[%s263_s18] sm:$0x3] %v672_v25 }
 0x126 PF: > { %s18_s23 = sadd.s32 1, %s973_s23  }
 0x127   : > { %p15_p4 = scmp.ge.s32.totalorder %s18_s23, 4  }
 0x129   :  { %17 = sbr.rel (!%p15_p4) target bundleno = 2 (0x2), region = 84 }

// kernel: tile.23
= control target key start
LH: loop header
LB: loop body
LE: loop exit
PB: predicated region body
PF: predicated region fallthrough
CT: control target
= control target key end

     0   :  { %s28_s0 = inlined_call_operand.vmem [shape: f32[8], index: 0, kind: input, shape index: {}]   ;;  %s29_s1 = inlined_call_operand.vmem [shape: f32[16,8], index: 1, kind: output, shape index: {}]  }
   0x1   :  { %v4_v0 = vld [vmem:[%s28_s0] ss:$0 sm:$0xff] }
   0x2   :  { %5 = vst [vmem:[%s29_s1] sm:$0xff] %v4_v0  ;;  %8 = vst [vmem:[%s29_s1 + $0x8] sm:$0xff] %v4_v0 }

// kernel: tile.24
= control target key start
LH: loop header
LB: loop body
LE: loop exit
PB: predicated region body
PF: predicated region fallthrough
CT: control target
= control target key end

     0   :  { %s133_s10 = smov 120   ;;  %s134_s11 = smov 104   ;;  %vm3_vm0 = vcmask 64512   ;;  %vm9_vm1 = vcmask 1048512   ;;  %vm15_vm2 = vcmask 982912   ;;  %vm21_vm3 = vcmask 917312   ;;  %s209_s0 = inlined_call_operand.vmem [shape: f32[16,8], index: 0, kind: input, shape index: {}]   ;;  %s210_s1 = inlined_call_operand.vmem [shape: f32[1,128], index: 1, kind: output, shape index: {}]  }
   0x1   :  { %v103_v0 = vld [vmem:[%s209_s0 + $0xf] sm:$0x1]   ;;  %v105_v1 = vld [vmem:[%s209_s0 + $0xd] sm:$0x1]   ;;  %v104_v2 = vld [vmem:[%s209_s0 + $0xe] sm:$0x1]  }
   0x2   :  { %7 = vrot.lane.b32.xlu0 %v103_v0, %s133_s10  ;;  %19 = vrot.lane.b32.xlu1 %v105_v1, %s134_s11  ;;  %v106_v3 = vld [vmem:[%s209_s0 + $0xc] sm:$0x1]   ;;  %s135_s16 = smov 112   ;;  %s136_s17 = smov 96   ;;  %v107_v4 = vld [vmem:[%s209_s0 + $0xb] sm:$0x1]  }
   0x3   :  { %v108_v5 = vld [vmem:[%s209_s0 + $0xa] sm:$0x1]   ;;  %v2_v6 = vld [vmem:[%s209_s0] sm:$0x1]   ;;  %s137_s24 = smov 88   ;;  %s138_s25 = smov 80  }
   0x4   :  { %4 = vst.msk [vmem:[#allocation0] sm:$0x1] %vm3_vm0, %v2_v6   ;;  %v109_v7 = vld [vmem:[%s209_s0 + $0x9] sm:$0x1]   ;;  %v110_v8 = vld [vmem:[%s209_s0 + $0x8] sm:$0x1]  }
   0x5   :  { %s139_s30 = smov 72   ;;  %s140_s2 = smov 64   ;;  %v111_v9 = vld [vmem:[%s209_s0 + $0x7] sm:$0x1]   ;;  %v112_v10 = vld [vmem:[%s209_s0 + $0x6] sm:$0x1]  }
   0x6   :  { %13 = vrot.lane.b32.xlu0 %v104_v2, %s135_s16  ;;  %25 = vrot.lane.b32.xlu1 %v106_v3, %s136_s17  ;;  %s141_s7 = smov 56   ;;  %s142_s8 = smov 48   ;;  %v113_v11 = vld [vmem:[%s209_s0 + $0x5] sm:$0x1]   ;;  %v114_v12 = vld [vmem:[%s209_s0 + $0x4] sm:$0x1]  }
   0x7   :  { %s143_s13 = smov 40   ;;  %s144_s14 = smov 32   ;;  %v115_v13 = vld [vmem:[%s209_s0 + $0x3] sm:$0x1]   ;;  %v116_v14 = vld [vmem:[%s209_s0 + $0x2] sm:$0x1]  }
   0x8   :  { %s145_s19 = smov 24   ;;  %s146_s20 = smov 16   ;;  %v117_v15 = vld [vmem:[%s209_s0 + $0x1] sm:$0x1]   ;;  %vm27_vm4 = vcmask 851712   ;;  %vm33_vm5 = vcmask 786112  }
   0x9   :  { %s147_s0 = smov 8   ;;  %vm39_vm6 = vcmask 720512   ;;  %vm45_vm7 = vcmask 654912   ;;  %vm51_vm8 = vcmask 589312   ;;  %vm57_vm9 = vcmask 523712  }
   0xa   :  { %31 = vrot.lane.b32.xlu0 %v107_v4, %s137_s24  ;;  %37 = vrot.lane.b32.xlu1 %v108_v5, %s138_s25  ;;  %vm63_vm10 = vcmask 458112   ;;  %vm69_vm11 = vcmask 392512   ;;  %vm75_vm12 = vcmask 326912   ;;  %vm81_vm13 = vcmask 261312  }
   0xb   :  { %vm87_vm14 = vcmask 195712   ;;  %vm93_vm15 = vcmask 130112  }
   0xe   :  { %43 = vrot.lane.b32.xlu0 %v109_v7, %s139_s30  ;;  %49 = vrot.lane.b32.xlu1 %v110_v8, %s140_s2 }
  0x12   :  { %55 = vrot.lane.b32.xlu0 %v111_v9, %s141_s7  ;;  %61 = vrot.lane.b32.xlu1 %v112_v10, %s142_s8 }
  0x16   :  { %67 = vrot.lane.b32.xlu0 %v113_v11, %s143_s13  ;;  %73 = vrot.lane.b32.xlu1 %v114_v12, %s144_s14 }
  0x1a   :  { %79 = vrot.lane.b32.xlu0 %v115_v13, %s145_s19  ;;  %85 = vrot.lane.b32.xlu1 %v116_v14, %s146_s20 }
  0x1e   :  { %91 = vrot.lane.b32.xlu0 %v117_v15, %s147_s0 }
  0x74   :  { %v8_v16 = vpop.permute.xlu0 %7   ;;  %v20_v17 = vpop.permute.xlu1 %19  }
  0x75   :  { %10 = vst.msk [vmem:[#allocation0] sm:$0x1] %vm9_vm1, %v8_v16  }
  0x78   :  { %v14_v18 = vpop.permute.xlu0 %13   ;;  %v26_v19 = vpop.permute.xlu1 %25  }
  0x79   :  { %16 = vst.msk [vmem:[#allocation0] sm:$0x1] %vm15_vm2, %v14_v18  }
  0x7a   :  { %22 = vst.msk [vmem:[#allocation0] sm:$0x1] %vm21_vm3, %v20_v17  }
  0x7b   :  { %28 = vst.msk [vmem:[#allocation0] sm:$0x1] %vm27_vm4, %v26_v19  }
  0x7c   :  { %v32_v20 = vpop.permute.xlu0 %31   ;;  %v38_v21 = vpop.permute.xlu1 %37  }
  0x7d   :  { %34 = vst.msk [vmem:[#allocation0] sm:$0x1] %vm33_vm5, %v32_v20  }
  0x7e   :  { %40 = vst.msk [vmem:[#allocation0] sm:$0x1] %vm39_vm6, %v38_v21  }
  0x80   :  { %v44_v22 = vpop.permute.xlu0 %43   ;;  %v50_v23 = vpop.permute.xlu1 %49  }
  0x81   :  { %46 = vst.msk [vmem:[#allocation0] sm:$0x1] %vm45_vm7, %v44_v22  }
  0x82   :  { %52 = vst.msk [vmem:[#allocation0] sm:$0x1] %vm51_vm8, %v50_v23  }
  0x84   :  { %v56_v24 = vpop.permute.xlu0 %55   ;;  %v62_v25 = vpop.permute.xlu1 %61  }
  0x85   :  { %58 = vst.msk [vmem:[#allocation0] sm:$0x1] %vm57_vm9, %v56_v24  }
  0x86   :  { %64 = vst.msk [vmem:[#allocation0] sm:$0x1] %vm63_vm10, %v62_v25  }
  0x88   :  { %v68_v26 = vpop.permute.xlu0 %67   ;;  %v74_v27 = vpop.permute.xlu1 %73  }
  0x89   :  { %70 = vst.msk [vmem:[#allocation0] sm:$0x1] %vm69_vm11, %v68_v26  }
  0x8a   :  { %76 = vst.msk [vmem:[#allocation0] sm:$0x1] %vm75_vm12, %v74_v27  }
  0x8c   :  { %v80_v28 = vpop.permute.xlu0 %79   ;;  %v86_v29 = vpop.permute.xlu1 %85  }
  0x8d   :  { %82 = vst.msk [vmem:[#allocation0] sm:$0x1] %vm81_vm13, %v80_v28  }
  0x8e   :  { %88 = vst.msk [vmem:[#allocation0] sm:$0x1] %vm87_vm14, %v86_v29  }
  0x90   :  { %v92_v30 = vpop.permute.xlu0 %91  }
  0x91   :  { %94 = vst.msk [vmem:[#allocation0] sm:$0x1] %vm93_vm15, %v92_v30  }
  0x98   :  { %v99_v31 = vld [vmem:[#allocation0] sm:$0x1] }
  0x99   :  { %102 = vst [vmem:[%s210_s1] sm:$0x1] %v99_v31 }

// kernel: residual_block.4
= control target key start
LH: loop header
LB: loop body
LE: loop exit
PB: predicated region body
PF: predicated region fallthrough
CT: control target
= control target key end

     0   :  { %s1022_s23 = smov 0   ;;  %s1163_s0 = inlined_call_operand.vmem [shape: bf16[2,16,128], index: 0, kind: input, shape index: {}]   ;;  %s1164_s1 = inlined_call_operand.vmem [shape: f32[1,128], index: 1, kind: input, shape index: {}]   ;;  %s1165_s2 = inlined_call_operand.vmem [shape: f32[1,128], index: 2, kind: input, shape index: {}]   ;;  %s1166_s3 = inlined_call_operand.<no memory space> [shape: f32[1], index: 3, kind: input, shape index: {}]   ;;  %s1167_s4 = inlined_call_operand.vmem [shape: bf16[3,128,128], index: 4, kind: input, shape index: {}]   ;;  %s1168_s5 = inlined_call_operand.vmem [shape: bf16[2,16,128], index: 5, kind: output, shape index: {0}]   ;;  %s1169_s6 = inlined_call_operand.vmem [shape: f32[2,2,128], index: 6, kind: output, shape index: {1}]  }
   0x1   :  { %12 = sst [smem:[#allocation2]] %s1166_s3 }
   0x2 LB: > { %s762_s24 = sadd.s32 4294967295, %s979_s23   ;;  %p766_p0 = scmp.ge.s32.totalorder %s979_s23, 1  ;;  %s979_s23 = sphi %s1022_s23, %s18_s23  }
   0x3   : > { %p216_p1 = scmp.lt.s32.totalorder %s979_s23, 3 }
   0x5   : > { %p217_p2 = pnand %p766_p0, %p216_p1 }
   0x6   : > { %p250_p3 = scmp.lt.s32.totalorder (!%p217_p2), %s762_s24, 1  ;;  %s287_s27 = sld [smem:[#allocation2]] (!%p217_p2) }
   0x7   : > { %220 = sbr.rel (%p217_p2) target bundleno = 294 (0x126), region = 40 }
   0xc   : > { %v949_v0 = vld [vmem:[%s1167_s4 + $0x78] sm:$0xff]   ;;  %v981_v1 = vmov 0.0   ;;  %v951_v3 = vld [vmem:[%s1167_s4 + $0x70] sm:$0xff]   ;;  %vm982_vm0 = vmmov 0   ;;  %v953_v5 = vld [vmem:[%s1167_s4 + $0x68] sm:$0xff]   ;;  %s1171_s24 = smov (!%p250_p3, %s762_s24), 1  ;;  %v290_v24 = vstv %s287_s27 }
   0xd   : > { %878 = vmatprep.subr.bf16.mxu0 %v981_v1  ;;  %898 = vmatprep.subr.bf16.mxu1 %v981_v1  ;;  %v950_v2 = vld [vmem:[%s1167_s4 + $0x38] sm:$0xff]   ;;  %v952_v4 = vld [vmem:[%s1167_s4 + $0x30] sm:$0xff]   ;;  %v954_v6 = vld [vmem:[%s1167_s4 + $0x28] sm:$0xff]   ;;  %s838_s14 = sshll.u32 %s1171_s24, 3  ;;  %vm297_vm3 = vcmask 1040384   ;;  %vm983_vm5 = vmmov 1  }
   0xe   : > { %879 = vmatpush3.bf16.msra.mxu0 %v949_v0  ;;  %894 = vmatprep.mubr.msk.bf16.mxu0 %vm982_vm0, %v981_v1  ;;  %v955_v7 = vld [vmem:[%s1167_s4 + $0x60] sm:$0xff]   ;;  %s254_s19 = scalar_lea.vmem %s1163_s0, %s838_s14  ;;  %v957_v9 = vld [vmem:[%s1167_s4 + $0x58] sm:$0xff]   ;;  %v959_v15 = vld [vmem:[%s1167_s4 + $0x50] sm:$0xff]   ;;  %vm341_vm7 = vsmask.f32 7424  ;;  %vm552_vm8 = vcmask 1046528   ;;  %s259_s15 = scalar_lea.vmem %s1168_s5, %s838_s14 }
   0xf   : > { %899 = vmatpush3.bf16.msra.mxu1 %v950_v2  ;;  %880 = vmatprep.subr.bf16.mxu0 %v981_v1  ;;  %v956_v8 = vld [vmem:[%s1167_s4 + $0x20] sm:$0xff]   ;;  %v958_v10 = vld [vmem:[%s1167_s4 + $0x18] sm:$0xff]   ;;  %v960_v17 = vld [vmem:[%s1167_s4 + $0x10] sm:$0xff]   ;;  %s771_s16 = sshll.u32 %s1171_s24, 1 }
  0x10   : > { %900 = vmatprep.subr.bf16.mxu1 %v981_v1  ;;  %914 = vmatprep.mubr.msk.bf16.mxu1 %vm982_vm0, %v981_v1  ;;  %v843_v11 = vld [vmem:[%s254_s19] sm:$0xff]   ;;  %v961_v20 = vld [vmem:[%s1167_s4 + $0x48] sm:$0xff]   ;;  %vm806_vm4 = vmneg %vm297_vm3  ;;  %s263_s18 = scalar_lea.vmem %s1169_s6, %s771_s16 }
  0x11   : > { %v772_v12 = vld [vmem:[%s1164_s1] ss:$0 sm:$0xff]  ;;  %v844_v13 = vunpack.c.l.bf16 %v843_v11  ;;  %v845_v14 = vunpack.c.h.bf16 %v843_v11  ;;  %v962_v23 = vld [vmem:[%s1167_s4 + $0x8] sm:$0xff]   ;;  %vm807_vm6 = vmpackc.low %vm983_vm5, %vm806_vm4 }
  0x12   : > { %881 = vmatpush3.bf16.msra.mxu0 %v951_v3  ;;  %v773_v16 = vld [vmem:[%s1165_s2] ss:$0 sm:$0xff]  ;;  %v965_v45 = vld [vmem:[%s1167_s4 + $0xb8] sm:$0xff]   ;;  %v966_v47 = vld [vmem:[%s1167_s4 + $0xb0] sm:$0xff]  }
  0x13   : > { %901 = vmatpush3.bf16.msra.mxu1 %v952_v4  ;;  %882 = vmatprep.subr.bf16.mxu0 %v981_v1  ;;  %v276_v18 = vmul.f32 %v844_v13, %v772_v12  ;;  %v277_v19 = vmul.f32 %v845_v14, %v772_v12  ;;  %v963_v27 = vld [vmem:[%s1167_s4 + $0x40] sm:$0xff]   ;;  %v967_v48 = vld [vmem:[%s1167_s4 + $0xa8] sm:$0xff]   ;;  %v969_v50 = vld [vmem:[%s1167_s4 + $0x98] sm:$0xff]  }
  0x14   : > { %902 = vmatprep.subr.bf16.mxu1 %v981_v1  ;;  %v964_v30 = vld [vmem:[%s1167_s4] sm:$0xff]   ;;  %v970_v51 = vld [vmem:[%s1167_s4 + $0x90] sm:$0xff]   ;;  %v971_v52 = vld [vmem:[%s1167_s4 + $0x88] sm:$0xff]  }
  0x15   : > { %v285_v21 = vadd.f32 %v773_v16, %v276_v18  ;;  %v286_v22 = vadd.f32 %v773_v16, %v277_v19  ;;  %v968_v49 = vld [vmem:[%s1167_s4 + $0xa0] sm:$0xff]  }
  0x16   : > { %883 = vmatpush3.bf16.msra.mxu0 %v953_v5  ;;  %v972_v53 = vld [vmem:[%s1167_s4 + $0x80] sm:$0xff]  }
  0x17   : > { %903 = vmatpush3.bf16.msra.mxu1 %v954_v6  ;;  %884 = vmatprep.subr.bf16.mxu0 %v981_v1  ;;  %vm288_vm1 = vcmp.gt.f32.partialorder %v285_v21, 0.0  ;;  %vm289_vm2 = vcmp.gt.f32.partialorder %v286_v22, 0.0  ;;  %v291_v25 = vmul.f32 %v290_v24, %v285_v21  ;;  %v292_v26 = vmul.f32 %v290_v24, %v286_v22 }
  0x18   : > { %904 = vmatprep.subr.bf16.mxu1 %v981_v1 }
  0x19   : > { %v293_v28 = vsel %vm288_vm1, %v285_v21, %v291_v25  ;;  %v294_v29 = vsel %vm289_vm2, %v286_v22, %v292_v26 }
  0x1a   : > { %885 = vmatpush3.bf16.msra.mxu0 %v955_v7  ;;  %v298_v31 = vrot.slane %v293_v28, 7  ;;  %v299_v32 = vrot.slane %v294_v29, 7 }
  0x1b   : > { %905 = vmatpush3.bf16.msra.mxu1 %v956_v8  ;;  %886 = vmatprep.subr.bf16.mxu0 %v981_v1 }
  0x1c   : > { %906 = vmatprep.subr.bf16.mxu1 %v981_v1  ;;  %v300_v33 = vsel %vm297_vm3, %v298_v31, %v299_v32  ;;  %v304_v34 = vsel %vm297_vm3, 0.0, %v298_v31  ;;  %v305_v35 = vsel %vm297_vm3, %v299_v32, 0.0 }
  0x1d   : > { %v306_v36 = vpack.c.bf16 %v300_v33, %v304_v34  ;;  %v323_v37 = vpack.c.bf16 %v305_v35, %v305_v35  ;;  %v808_v38 = vpack.c.bf16 %v300_v33, %v298_v31 }
  0x1e   : > { %887 = vmatpush3.bf16.msra.mxu0 %v957_v9 }
  0x1f   : > { %907 = vmatpush3.bf16.msra.mxu1 %v958_v10  ;;  %888 = vmatprep.subr.bf16.mxu0 %v981_v1  ;;  %v343_v39 = vshrl.u32 %v306_v36, 16  ;;  %v345_v40 = vshll.u32 %v306_v36, 16  ;;  %v350_v41 = vshll.u32 %v323_v37, 16  ;;  %v553_v54 = vrot.slane %v306_v36, 1 }
  0x20   : > { %908 = vmatprep.subr.bf16.mxu1 %v981_v1  ;;  %v554_v55 = vrot.slane %v323_v37, 1 }
  0x21   : > { %v347_v42 = vrot.slane %v345_v40, 1  ;;  %v352_v43 = vrot.slane %v350_v41, 1 }
  0x22   : > { %889 = vmatpush3.bf16.msra.mxu0 %v959_v15  ;;  %v555_v56 = vsel %vm552_vm8, %v553_v54, %v554_v55 }
  0x23   : > { %909 = vmatpush3.bf16.msra.mxu1 %v960_v17  ;;  %890 = vmatprep.subr.bf16.mxu0 %v981_v1  ;;  %v348_v44 = vor.u32 %v347_v42, %v343_v39 }
  0x24   : > { %910 = vmatprep.subr.bf16.mxu1 %v981_v1 }
  0x25   : > { %v353_v46 = vsel %vm341_vm7, %v348_v44, %v352_v43 }
  0x26   : > { %891 = vmatpush3.bf16.msra.mxu0 %v961_v20 }
  0x27   : > { %911 = vmatpush3.bf16.msra.mxu1 %v962_v23  ;;  %892 = vmatprep.subr.bf16.mxu0 %v981_v1 }
  0x28   : > { %912 = vmatprep.subr.bf16.mxu1 %v981_v1 }
  0x2a   : > { %893 = vmatpush3.bf16.msra.mxu0 %v963_v27 }
  0x2b   : > { %913 = vmatpush3.bf16.msra.mxu1 %v964_v30  ;;  %918 = vmatprep.subr.bf16.mxu0 %v981_v1 }
  0x2d   : > { %895 = vmatmul.mubr.bf16.vlgmr.msra.gmra.mxu0 %v353_v46 }
  0x2e   : > { %915 = vmatmul.mubr.msk.bf16.vlgmr.msra.gmra.mxu1 %vm807_vm6, %v808_v38  ;;  %919 = vmatpush3.bf16.msra.mxu0 %v965_v45 }
  0x2f   : > { %934 = vmatprep.mubr.msk.bf16.mxu0 %vm982_vm0, %v981_v1  ;;  %920 = vmatprep.subr.bf16.mxu0 %v981_v1 }
  0x32   : > { %921 = vmatpush3.bf16.msra.mxu0 %v966_v47 }
  0x33   : > { %922 = vmatprep.subr.bf16.mxu0 %v981_v1 }
  0x36   : > { %923 = vmatpush3.bf16.msra.mxu0 %v967_v48 }
  0x37   : > { %924 = vmatprep.subr.bf16.mxu0 %v981_v1 }
  0x3a   : > { %925 = vmatpush3.bf16.msra.mxu0 %v968_v49 }
  0x3b   : > { %926 = vmatprep.subr.bf16.mxu0 %v981_v1 }
  0x3e   : > { %927 = vmatpush3.bf16.msra.mxu0 %v969_v50 }
  0x3f   : > { %928 = vmatprep.subr.bf16.mxu0 %v981_v1 }
  0x42   : > { %929 = vmatpush3.bf16.msra.mxu0 %v970_v51 }
  0x43   : > { %930 = vmatprep.subr.bf16.mxu0 %v981_v1 }
  0x46   : > { %931 = vmatpush3.bf16.msra.mxu0 %v971_v52 }
  0x47   : > { %932 = vmatprep.subr.bf16.mxu0 %v981_v1 }
  0x4a   : > { %933 = vmatpush3.bf16.msra.mxu0 %v972_v53 }
  0x4d   : > { %935 = vmatmul.mubr.bf16.vlgmr.msra.gmra.mxu0 %v555_v56 }
  0xed   : > { %v437_v60 = vpop.f32.mrf.mxu0 }
  0xee   : > { %v526_v57 = vpop.f32.mrf.mxu1 }
  0xef   : > { %v896_v62 = vpop.f32.mrf.mxu0  ;;  %v527_v3 = vadd.f32 %v526_v57, %v437_v60 }
  0xf0   : > { %v916_v58 = vpop.f32.mrf.mxu1 }
  0xf1   : > { %v440_v63 = vpop.f32.mrf.mxu0 }
  0xf2   : > { %v529_v59 = vpop.f32.mrf.mxu1 }
  0xf3   : > { %v897_v0 = vpop.f32.mrf.mxu0  ;;  %v530_v5 = vadd.f32 %v529_v59, %v440_v63 }
  0xf4   : > { %v917_v61 = vpop.f32.mrf.mxu1 }
 0x10d   : > { %v639_v2 = vpop.f32.mrf.mxu0 }
 0x10e   : > { %v646_v6 = vadd.f32 %v639_v2, %v527_v3 }
 0x10f   : > { %v936_v4 = vpop.f32.mrf.mxu0 }
 0x110   : > { %v665_v9 = vmul.f32 %v646_v6, %v646_v6 }
 0x111   : > { %v642_v7 = vpop.f32.mrf.mxu0 }
 0x112   : > { %v647_v1 = vadd.f32 %v642_v7, %v530_v5 }
 0x113   : > { %v937_v8 = vpop.f32.mrf.mxu0 }
 0x114   : > { %v849_v10 = vpack.c.bf16 %v647_v1, %v646_v6  ;;  %v658_v11 = vadd.f32 %v647_v1, %v646_v6  ;;  %v666_v12 = vmul.f32 %v647_v1, %v647_v1 }
 0x116   : > { %850 = vst [vmem:[%s259_s15] sm:$0xff] %v849_v10   ;;  %v659_v13 = vrot.slane %v658_v11, 4  ;;  %v667_v14 = vadd.f32 %v666_v12, %v665_v9 }
 0x118   : > { %v660_v15 = vadd.f32 %v659_v13, %v658_v11  ;;  %v668_v16 = vrot.slane %v667_v14, 4 }
 0x11a   : > { %v661_v17 = vrot.slane %v660_v15, 2  ;;  %v669_v18 = vadd.f32 %v668_v16, %v667_v14 }
 0x11c   : > { %v662_v19 = vadd.f32 %v661_v17, %v660_v15  ;;  %v670_v20 = vrot.slane %v669_v18, 2 }
 0x11e   : > { %v663_v21 = vrot.slane %v662_v19, 1  ;;  %v671_v22 = vadd.f32 %v670_v20, %v669_v18 }
 0x120   : > { %v672_v23 = vrot.slane %v671_v22, 1  ;;  %v664_v24 = vadd.f32 %v663_v21, %v662_v19 }
 0x122   : > { %v673_v25 = vadd.f32 %v672_v23, %v671_v22 }
 0x124   : > { %v674_v26 = vsel %vm297_vm3, %v664_v24, %v673_v25 }
 0x125   : > { %675 = vst [vmem:[%s263_s18] sm:$0x3] %v674_v26 }
 0x126 PF: > { %s18_s23 = sadd.s32 1, %s979_s23  }
 0x127   : > { %p15_p4 = scmp.ge.s32.totalorder %s18_s23, 4  }
 0x129   :  { %17 = sbr.rel (!%p15_p4) target bundleno = 2 (0x2), region = 84 }

// kernel: residual_block.5
= control target key start
LH: loop header
LB: loop body
LE: loop exit
PB: predicated region body
PF: predicated region fallthrough
CT: control target
= control target key end

     0   :  { %s320_s15 = smov 0   ;;  %s364_s0 = inlined_call_operand.vmem [shape: f32[32,128], index: 0, kind: input, shape index: {}]   ;;  %s365_s1 = inlined_call_operand.vmem [shape: bf16[32,128], index: 1, kind: input, shape index: {}]   ;;  %s366_s2 = inlined_call_operand.vmem [shape: f32[1,128], index: 2, kind: input, shape index: {}]   ;;  %s367_s3 = inlined_call_operand.vmem [shape: f32[1,128], index: 3, kind: input, shape index: {}]   ;;  %s368_s4 = inlined_call_operand.vmem [shape: f32[32,128], index: 4, kind: output, shape index: {}]  }
   0x1 LB: > { %s296_s16 = sadd.s32 4294967295, %s322_s15   ;;  %p300_p0 = scmp.ge.s32.totalorder %s322_s15, 1  ;;  %s322_s15 = sphi %s320_s15, %s14_s15  }
   0x2   : > { %p170_p1 = scmp.lt.s32.totalorder %s322_s15, 5 }
   0x4   : > { %p171_p2 = pnand %p300_p0, %p170_p1 }
   0x5   : > { %p198_p3 = scmp.lt.s32.totalorder (!%p171_p2), %s296_s16, 3 }
   0x6   : > { %174 = sbr.rel (%p171_p2) target bundleno = 24 (0x18), region = 36 }
   0xb   : > { %s370_s16 = smov (!%p198_p3, %s296_s16), 3  ;;  %v304_v1 = vld [vmem:[%s366_s2] ss:$0 sm:$0xff] }
   0xc   : > { %s301_s17 = sshll.u32 %s370_s16, 3  ;;  %s302_s18 = sshll.u32 %s370_s16, 2  ;;  %v305_v5 = vld [vmem:[%s367_s3] ss:$0 sm:$0xff] }
   0xd   : > { %s201_s21 = scalar_lea.vmem %s364_s0, %s301_s17  ;;  %s205_s24 = scalar_lea.vmem %s365_s1, %s302_s18 }
   0xe   : > { %v211_v0 = vld [vmem:[%s205_s24] sm:$0xf]  ;;  %s209_s5 = scalar_lea.vmem %s368_s4, %s301_s17 }
   0xf   : > { %v212_v2 = vunpack.c.l.bf16 %v211_v0  ;;  %v210_v3 = vld [vmem:[%s201_s21] sm:$0xff] }
  0x11   : > { %v220_v4 = vmul.f32 %v304_v1, %v212_v2 }
  0x13   : > { %v221_v6 = vadd.f32 %v220_v4, %v210_v3 }
  0x15   : > { %v229_v7 = vadd.f32 %v305_v5, %v221_v6 }
  0x17   : > { %230 = vst [vmem:[%s209_s5] sm:$0xff] %v229_v7 }
  0x18 PF: > { %s14_s15 = sadd.s32 1, %s322_s15  }
  0x19   : > { %p11_p4 = scmp.ge.s32.totalorder %s14_s15, 6  }
  0x1b   :  { %13 = sbr.rel (!%p11_p4) target bundleno = 1 (0x1), region = 69 }

</bundles_post_ra>
